<compile_context>
chip_gen: v7x
topology: tpu7x:2x2x1
jax: 0.10.0
libtpu: 0.0.40
codegen_flags: <defaults>
</compile_context>

<pallas_src>
import functools

import jax
import jax.numpy as jnp
from jax import lax
from jax.experimental import pallas as pl
from jax.experimental.pallas import tpu as pltpu


def _linear_average_kernel(x_ref, m_ref, o_ref):
    # x_ref: (tm, D), m_ref: (tn, D), o_ref: (tm, tn)
    x = x_ref[...].astype(jnp.float32)
    m = m_ref[...].astype(jnp.float32)

    # Squared norms (lane-axis reductions, XLU).
    x_sq = jnp.sum(x * x, axis=1, keepdims=True)      # (tm, 1)
    m_sq = jnp.sum(m * m, axis=1, keepdims=True)      # (tn, 1)

    # x @ m^T on the MXU, f32 accumulation.
    xm = lax.dot_general(
        x, m,
        dimension_numbers=(((1,), (1,)), ((), ())),
        preferred_element_type=jnp.float32,
    )                                                  # (tm, tn)

    d2 = x_sq + jnp.transpose(m_sq) - 2.0 * xm
    d2 = jnp.maximum(d2, 0.0)                          # guard tiny negatives
    dist = jnp.sqrt(d2)
    o_ref[...] = (1.0 / (1.0 + dist)).astype(o_ref.dtype)


def _pick_block(dim, target, align):
    """Largest block <= target that is a multiple of `align` and evenly
    divides `dim`; falls back to the full dim when `dim` is not aligned."""
    if dim % align != 0 or dim <= target:
        return dim
    b = (target // align) * align
    while dim % b != 0:
        b -= align
    return b


@functools.partial(jax.jit, static_argnames=("block_m", "block_n"))
def linear_average_forward(x, memory, *, block_m=256, block_n=1024):
    """out[i, j] = 1 / (1 + ||x[i] - memory[j]||)  == LinearAverage.forward."""
    M, D = x.shape
    N, Dm = memory.shape
    assert D == Dm, "feature dims of x and memory must match"

    tm = _pick_block(M, block_m, 8)     # sublane-aligned query tile
    tn = _pick_block(N, block_n, 128)   # lane-dense output tile
    grid = (M // tm, N // tn)

    return pl.pallas_call(
        _linear_average_kernel,
        out_shape=jax.ShapeDtypeStruct((M, N), x.dtype),
        grid_spec=pltpu.PrefetchScalarGridSpec(
            num_scalar_prefetch=0,
            grid=grid,
            in_specs=[
                pl.BlockSpec((tm, D), lambda i, j: (i, 0)),   # x rows
                pl.BlockSpec((tn, D), lambda i, j: (j, 0)),   # memory rows
            ],
            out_specs=pl.BlockSpec((tm, tn), lambda i, j: (i, j)),
        ),
        compiler_params=pltpu.CompilerParams(
            dimension_semantics=("parallel", "parallel")),
    )(x, memory)


if __name__ == "__main__":
    key = jax.random.PRNGKey(0)
    kx, km = jax.random.split(key)

    # Small shapes consistent with the module:
    #   x: (batch, inputSize), memory: (outputSize, inputSize)
    batch, input_size, output_size = 8, 32, 128
    x = jax.random.normal(kx, (batch, input_size), dtype=jnp.float32)
    memory = jax.random.normal(km, (output_size, input_size), dtype=jnp.float32)

    out = linear_average_forward(x, memory)
    jax.block_until_ready(out)

    # Pure-JAX reference: 1 / (1 + cdist(x, memory))
    diff = x[:, None, :] - memory[None, :, :]
    dist_ref = jnp.sqrt(jnp.sum(diff * diff, axis=-1))
    ref = 1.0 / (1.0 + dist_ref)

    assert out.shape == (batch, output_size)
    assert out.dtype == x.dtype
    assert jnp.allclose(out, ref, rtol=1e-4, atol=1e-5), float(
        jnp.max(jnp.abs(out - ref)))

    print("KERNEL_OK")
</pallas_src>

<mosaic_0001>
module attributes {stable_mosaic.version = 11 : i64} {
  func.func @_linear_average_kernel(%arg0: i32, %arg1: i32, %arg2: memref<8x32xf32, #tpu.memory_space<vmem>>, %arg3: memref<128x32xf32, #tpu.memory_space<vmem>>, %arg4: memref<8x128xf32, #tpu.memory_space<vmem>>) attributes {dimension_semantics = [#tpu.dimension_semantics<parallel>, #tpu.dimension_semantics<parallel>], iteration_bounds = array<i64: 1, 1>, scalar_prefetch = 0 : i64, scratch_operands = 0 : i64, tpu.core_type = #tpu.core_type<tc>, window_params = [{transform_indices = @transform_0, window_bounds = array<i64: 8, 32>}, {transform_indices = @transform_1, window_bounds = array<i64: 128, 32>}, {transform_indices = @transform_2, window_bounds = array<i64: 8, 128>}]} {
    %c0 = arith.constant 0 : index
    %c0_0 = arith.constant 0 : index
    %0 = vector.load %arg2[%c0, %c0_0] : memref<8x32xf32, #tpu.memory_space<vmem>>, vector<8x32xf32>
    %c0_1 = arith.constant 0 : index
    %c0_2 = arith.constant 0 : index
    %1 = vector.load %arg3[%c0_1, %c0_2] : memref<128x32xf32, #tpu.memory_space<vmem>>, vector<128x32xf32>
    %2 = arith.mulf %0, %0 : vector<8x32xf32>
    %cst = arith.constant dense<0.000000e+00> : vector<8xf32>
    %3 = vector.multi_reduction <add>, %2, %cst [1] : vector<8x32xf32> to vector<8xf32>
    %4 = vector.shape_cast %3 : vector<8xf32> to vector<8x1xf32>
    %5 = arith.mulf %1, %1 : vector<128x32xf32>
    %cst_3 = arith.constant dense<0.000000e+00> : vector<128xf32>
    %6 = vector.multi_reduction <add>, %5, %cst_3 [1] : vector<128x32xf32> to vector<128xf32>
    %7 = vector.shape_cast %6 : vector<128xf32> to vector<128x1xf32>
    %cst_4 = arith.constant dense<0.000000e+00> : vector<8x128xf32>
    %8 = tpu.matmul %0, %1, %cst_4 {dimension_numbers = #tpu.dot_dimension_numbers<[1], [1], [0], [0], [0, 0, 1, 0], [], []>} : vector<8x32xf32>, vector<128x32xf32>, vector<8x128xf32> -> vector<8x128xf32>
    %9 = tpu.transpose %7, [1, 0] : vector<128x1xf32> -> vector<1x128xf32>
    %10 = vector.broadcast %4 : vector<8x1xf32> to vector<8x128xf32>
    %11 = vector.broadcast %9 : vector<1x128xf32> to vector<8x128xf32>
    %12 = arith.addf %10, %11 : vector<8x128xf32>
    %cst_5 = arith.constant 2.000000e+00 : f32
    %13 = vector.broadcast %cst_5 : f32 to vector<8x128xf32>
    %14 = arith.mulf %13, %8 : vector<8x128xf32>
    %15 = arith.subf %12, %14 : vector<8x128xf32>
    %cst_6 = arith.constant 0.000000e+00 : f32
    %16 = vector.broadcast %cst_6 : f32 to vector<8x128xf32>
    %17 = arith.maximumf %15, %16 : vector<8x128xf32>
    %18 = math.sqrt %17 : vector<8x128xf32>
    %cst_7 = arith.constant 1.000000e+00 : f32
    %19 = vector.broadcast %cst_7 : f32 to vector<8x128xf32>
    %20 = arith.addf %19, %18 : vector<8x128xf32>
    %cst_8 = arith.constant 1.000000e+00 : f32
    %21 = vector.broadcast %cst_8 : f32 to vector<8x128xf32>
    %22 = arith.divf %21, %20 : vector<8x128xf32>
    %c0_9 = arith.constant 0 : index
    %c0_10 = arith.constant 0 : index
    %23 = vector.load %arg4[%c0_9, %c0_10] : memref<8x128xf32, #tpu.memory_space<vmem>>, vector<8x128xf32>
    tpu.vector_store %arg4[%c0_9, %c0_10], %22 {strides = array<i32>} : memref<8x128xf32, #tpu.memory_space<vmem>>, vector<8x128xf32>,
    return
  }
  func.func @transform_0(%arg0: i32, %arg1: i32) -> (i32, i32) {
    %c0_i32 = arith.constant 0 : i32
    %c0_i32_0 = arith.constant 0 : i32
    return %arg0, %c0_i32 : i32, i32
  }
  func.func @transform_1(%arg0: i32, %arg1: i32) -> (i32, i32) {
    %c0_i32 = arith.constant 0 : i32
    %c0_i32_0 = arith.constant 0 : i32
    return %arg1, %c0_i32 : i32, i32
  }
  func.func @transform_2(%arg0: i32, %arg1: i32) -> (i32, i32) {
    %c0_i32 = arith.constant 0 : i32
    return %arg0, %arg1 : i32, i32
  }
}

</mosaic_0001>

<bundles_post_ra>
// kernel: linear_average_forward.1
= control target key start
LH: loop header
LB: loop body
LE: loop exit
PB: predicated region body
PF: predicated region fallthrough
CT: control target
= control target key end

     0   :  { %vm30_vm0 = vcmask 261120   ;;  %v417_v3 = vmov 0.0|0.0   ;;  %vm418_vm2 = vmmov 0   ;;  %v419_v14 = vmov 0.0   ;;  %s547_s0 = inlined_call_operand.vmem [shape: f32[8,32], index: 0, kind: input, shape index: {}]   ;;  %s548_s1 = inlined_call_operand.vmem [shape: f32[128,32], index: 1, kind: input, shape index: {}]   ;;  %s549_s2 = inlined_call_operand.hbm [shape: f32[8,128], index: 2, kind: output, shape index: {}]  }
   0x1   :  { %v13_v0 = vld [vmem:[%s548_s1] sm:$0xff]  ;;  %v14_v1 = vld [vmem:[%s548_s1 + $0x8] sm:$0xff]  ;;  %v15_v2 = vld [vmem:[%s548_s1 + $0x10] sm:$0xff]  ;;  %353 = vmatprep.subr.bf16.mxu0 %v417_v3  ;;  %350 = vmatprep.mubr.msk.f32.mxu0 %vm418_vm2, %v419_v14 }
   0x2   :  { %v354_v4 = vpack.c.bf16 %v14_v1, %v13_v0  ;;  %vm448_vm1 = vmpackc.low %vm30_vm0, %vm30_vm0  ;;  %v34_v6 = vmul.f32 %v13_v0, %v13_v0  ;;  %v35_v7 = vmul.f32 %v14_v1, %v14_v1  ;;  %v16_v8 = vld [vmem:[%s548_s1 + $0x18] sm:$0xff]  ;;  %v36_v9 = vmul.f32 %v15_v2, %v15_v2  ;;  %v17_v11 = vld [vmem:[%s548_s1 + $0x20] sm:$0xff] }
   0x3   :  { %v37_v10 = vmul.f32 %v16_v8, %v16_v8  ;;  %v18_v16 = vld [vmem:[%s548_s1 + $0x28] sm:$0xff]  ;;  %v38_v17 = vmul.f32 %v17_v11, %v17_v11  ;;  %v19_v20 = vld [vmem:[%s548_s1 + $0x30] sm:$0xff] }
   0x4   :  { %356 = vmatpush3.bf16.xpose.msk.msra.mxu0 %vm448_vm1, %v354_v4  ;;  %v50_v12 = vsel %vm30_vm0, %v34_v6, 0.0  ;;  %v56_v13 = vsel %vm30_vm0, %v36_v9, 0.0  ;;  %v53_v15 = vsel %vm30_vm0, %v35_v7, 0.0  ;;  %v39_v19 = vmul.f32 %v18_v16, %v18_v16 }
   0x5   :  { %51 = vadd.xlane.f32.xlu0 %v50_v12  ;;  %357 = vmatprep.subr.bf16.mxu0 %v417_v3  ;;  %v59_v18 = vsel %vm30_vm0, %v37_v10, 0.0 }
   0x6   :  { %57 = vadd.xlane.f32.xlu1 %v56_v13 }
   0x7   :  { %7 = vsyncpa [#allocation3], 0  ;;  %v358_v21 = vpack.c.bf16 %v16_v8, %v15_v2  ;;  %v62_v22 = vsel %vm30_vm0, %v38_v17, 0.0  ;;  %v20_v23 = vld [vmem:[%s548_s1 + $0x38] sm:$0xff]  ;;  %v40_v24 = vmul.f32 %v19_v20, %v19_v20  ;;  %v65_v25 = vsel %vm30_vm0, %v39_v19, 0.0  ;;  %v21_v27 = vld [vmem:[%s548_s1 + $0x40] sm:$0xff] }
   0x8   :  { %v41_v26 = vmul.f32 %v20_v23, %v20_v23  ;;  %v22_v29 = vld [vmem:[%s548_s1 + $0x48] sm:$0xff]  ;;  %v42_v30 = vmul.f32 %v21_v27, %v21_v27  ;;  %v23_v33 = vld [vmem:[%s548_s1 + $0x50] sm:$0xff]  ;;  %v362_v34 = vpack.c.bf16 %v18_v16, %v17_v11  ;;  %v24_v36 = vld [vmem:[%s548_s1 + $0x58] sm:$0xff]  ;;  %v366_v47 = vpack.c.bf16 %v20_v23, %v19_v20 }
   0x9   :  { %54 = vadd.xlane.f32.xlu0 %v53_v15  ;;  %v68_v28 = vsel %vm30_vm0, %v40_v24, 0.0  ;;  %v43_v32 = vmul.f32 %v22_v29, %v22_v29  ;;  %v44_v37 = vmul.f32 %v23_v33, %v23_v33  ;;  %v45_v39 = vmul.f32 %v24_v36, %v24_v36  ;;  %v25_v40 = vld [vmem:[%s548_s1 + $0x60] sm:$0xff]  ;;  %v26_v42 = vld [vmem:[%s548_s1 + $0x68] sm:$0xff]  ;;  %v27_v46 = vld [vmem:[%s548_s1 + $0x70] sm:$0xff] }
   0xa   :  { %60 = vadd.xlane.f32.xlu1 %v59_v18  ;;  %v71_v31 = vsel %vm30_vm0, %v41_v26, 0.0  ;;  %v74_v35 = vsel %vm30_vm0, %v42_v30, 0.0  ;;  %v46_v43 = vmul.f32 %v25_v40, %v25_v40  ;;  %v47_v45 = vmul.f32 %v26_v42, %v26_v42  ;;  %v28_v49 = vld [vmem:[%s548_s1 + $0x78] sm:$0xff]  ;;  %v12_v53 = vld [vmem:[%s547_s0] sm:$0xff]  ;;  %s420_s0 = smov [#allocation2]  }
   0xb   :  { %v77_v38 = vsel %vm30_vm0, %v43_v32, 0.0  ;;  %v80_v41 = vsel %vm30_vm0, %v44_v37, 0.0  ;;  %v83_v44 = vsel %vm30_vm0, %v45_v39, 0.0  ;;  %v48_v50 = vmul.f32 %v27_v46, %v27_v46  ;;  %s276_s1 = sshll.u32 %s420_s0, 4  ;;  %s277_s1 = int_to_ptr.vmem [resolvable:$true] %s276_s1 }
   0xc   :  { %360 = vmatpush3.bf16.xpose.msk.msra.mxu0 %vm448_vm1, %v358_v21  ;;  %v86_v48 = vsel %vm30_vm0, %v46_v43, 0.0  ;;  %v89_v51 = vsel %vm30_vm0, %v47_v45, 0.0  ;;  %v49_v52 = vmul.f32 %v28_v49, %v28_v49  ;;  %v29_v55 = vmul.f32 %v12_v53, %v12_v53  ;;  %s393_s15 = scalar_lea.vmem %s277_s1, 128  ;;  %p398_p1 = scmp.lt.s32.totalorder %s277_s1, %s277_s1 }
   0xd   :  { %361 = vmatprep.subr.bf16.mxu0 %v417_v3  ;;  %63 = vadd.xlane.f32.xlu0 %v62_v22  ;;  %v92_v54 = vsel %vm30_vm0, %v48_v50, 0.0  ;;  %v370_v57 = vpack.c.bf16 %v22_v29, %v21_v27  ;;  %v374_v59 = vpack.c.bf16 %v24_v36, %v23_v33  ;;  %v378_v60 = vpack.c.bf16 %v26_v42, %v25_v40  ;;  %p394_p0 = scmp.ne.s32.totalorder %s277_s1, %s393_s15  ;;  %p399_p2 = scmp.lt.s32.totalorder %s393_s15, %s393_s15 }
   0xe   :  { %66 = vadd.xlane.f32.xlu1 %v65_v25  ;;  %v95_v56 = vsel %vm30_vm0, %v49_v52, 0.0  ;;  %v31_v58 = vsel %vm30_vm0, %v29_v55, 0.0  ;;  %v382_v61 = vpack.c.bf16 %v28_v49, %v27_v46  ;;  %v251_v14 = vlaneseq }
   0xf   :  { %p400_p3 = por %p399_p2, %p398_p1 }
  0x10   :  { %v252_v15 = vshrl.u32 %v251_v14, 7 }
  0x11   :  { %69 = vadd.xlane.f32.xlu0 %v68_v28  ;;  %p401_p4 = pnand %p400_p3, %p394_p0 }
  0x12   :  { %72 = vadd.xlane.f32.xlu1 %v71_v31  ;;  %v253_v16 = vsub.s32 0, %v252_v15 }
  0x14   :  { %364 = vmatpush3.bf16.xpose.msk.msra.mxu0 %vm448_vm1, %v362_v34 }
  0x15   :  { %365 = vmatprep.subr.bf16.mxu0 %v417_v3  ;;  %75 = vadd.xlane.f32.xlu0 %v74_v35 }
  0x16   :  { %78 = vadd.xlane.f32.xlu1 %v77_v38 }
  0x19   :  { %81 = vadd.xlane.f32.xlu0 %v80_v41 }
  0x1a   :  { %84 = vadd.xlane.f32.xlu1 %v83_v44 }
  0x1c   :  { %368 = vmatpush3.bf16.xpose.msk.msra.mxu0 %vm448_vm1, %v366_v47 }
  0x1d   :  { %369 = vmatprep.subr.bf16.mxu0 %v417_v3  ;;  %87 = vadd.xlane.f32.xlu0 %v86_v48 }
  0x1e   :  { %90 = vadd.xlane.f32.xlu1 %v89_v51 }
  0x21   :  { %93 = vadd.xlane.f32.xlu0 %v92_v54 }
  0x22   :  { %96 = vadd.xlane.f32.xlu1 %v95_v56 }
  0x24   :  { %372 = vmatpush3.bf16.xpose.msk.msra.mxu0 %vm448_vm1, %v370_v57 }
  0x25   :  { %373 = vmatprep.subr.bf16.mxu0 %v417_v3  ;;  %32 = vadd.xlane.f32.xlu0 %v31_v58 }
  0x2c   :  { %376 = vmatpush3.bf16.xpose.msk.msra.mxu0 %vm448_vm1, %v374_v59 }
  0x2d   :  { %377 = vmatprep.subr.bf16.mxu0 %v417_v3 }
  0x34   :  { %380 = vmatpush3.bf16.xpose.msk.msra.mxu0 %vm448_vm1, %v378_v60 }
  0x35   :  { %381 = vmatprep.subr.bf16.mxu0 %v417_v3 }
  0x3c   :  { %384 = vmatpush3.bf16.xpose.msk.msra.mxu0 %vm448_vm1, %v382_v61 }
  0x43   :  { %351 = vmatmul.mubr.msk.f32.vlgmr.msra.gmra.mrb[0].mxu0 %vm30_vm0, %v12_v53 }
  0x92   :  { %v52_v62 = vpop.xlane.xlu0 %51 }
  0x93   :  { %219 = vxpose.xlu1.b32.start [1/16] (narrow) %v52_v62, 8  ;;  %v58_v0 = vpop.xlane.xlu1 %57 }
  0x96   :  { %v55_v63 = vpop.xlane.xlu0 %54 }
  0x97   :  { %220 = vxpose.xlu1.b32.cont [2/16] (narrow) %v55_v63, 8  ;;  %v61_v1 = vpop.xlane.xlu1 %60 }
  0x9a   :  { %v64_v2 = vpop.xlane.xlu0 %63 }
  0x9b   :  { %221 = vxpose.xlu1.b32.cont [3/16] (narrow) %v58_v0, 8  ;;  %v67_v4 = vpop.xlane.xlu1 %66 }
  0x9e   :  { %v70_v6 = vpop.xlane.xlu0 %69 }
  0x9f   :  { %222 = vxpose.xlu1.b32.cont [4/16] (narrow) %v61_v1, 8  ;;  %v73_v3 = vpop.xlane.xlu1 %72 }
  0xa2   :  { %v76_v5 = vpop.xlane.xlu0 %75 }
  0xa3   :  { %223 = vxpose.xlu1.b32.cont [5/16] (narrow) %v64_v2, 8  ;;  %v79_v7 = vpop.xlane.xlu1 %78 }
  0xa6   :  { %v82_v8 = vpop.xlane.xlu0 %81 }
  0xa7   :  { %224 = vxpose.xlu1.b32.cont [6/16] (narrow) %v67_v4, 8  ;;  %v85_v9 = vpop.xlane.xlu1 %84 }
  0xaa   :  { %v88_v10 = vpop.xlane.xlu0 %87 }
  0xab   :  { %225 = vxpose.xlu1.b32.cont [7/16] (narrow) %v70_v6, 8  ;;  %v91_v11 = vpop.xlane.xlu1 %90 }
  0xae   :  { %v94_v12 = vpop.xlane.xlu0 %93 }
  0xaf   :  { %226 = vxpose.xlu1.b32.cont [8/16] (narrow) %v73_v3, 8  ;;  %v97_v13 = vpop.xlane.xlu1 %96 }
  0xb2   :  { %v33_v18 = vpop.xlane.xlu0 %32 }
  0xb3   :  { %227 = vxpose.xlu1.b32.cont [9/16] (narrow) %v76_v5, 8 }
  0xb7   :  { %228 = vxpose.xlu1.b32.cont [10/16] (narrow) %v79_v7, 8 }
  0xbb   :  { %229 = vxpose.xlu1.b32.cont [11/16] (narrow) %v82_v8, 8 }
  0xbf   :  { %230 = vxpose.xlu1.b32.cont [12/16] (narrow) %v85_v9, 8 }
  0xc3   :  { %231 = vxpose.xlu1.b32.cont [13/16] (narrow) %v88_v10, 8 }
  0xc7   :  { %232 = vxpose.xlu1.b32.cont [14/16] (narrow) %v91_v11, 8 }
  0xcb   :  { %233 = vxpose.xlu1.b32.cont [15/16] (narrow) %v94_v12, 8 }
  0xcf   :  { %234 = vxpose.xlu1.b32.end [16/16] (narrow) %v97_v13, 8 }
 0x113   :  { %v235_v17 = vpop.trf.xlu1 }
 0x114   :  { %v254_v19 = vrot.slane %v235_v17, %v253_v16 }
 0x116   :  { %v215_v20 = vpop.f32.mrb[0].mxu0  ;;  %v255_v21 = vadd.f32 %v254_v19, %v33_v18 }
 0x117   :  { %v256_v22 = vmul.f32 2.0, %v215_v20  ;;  %v352_v23 = vpop.f32.mrb[1].mxu0 }
 0x119   :  { %v257_v24 = vsub.f32 %v255_v21, %v256_v22 }
 0x11b   :  { %v258_v25 = vmax.f32 %v257_v24, 0.0 }
 0x11d   :  { %389 = vrsqrt.f32 %v258_v25  ;;  %vm261_vm3 = vcmp.eq.f32.partialorder %v258_v25, inf  ;;  %v264_v28 = vand.u32 2147483648, %v258_v25  ;;  %vm263_vm4 = vcmp.eq.f32.partialorder %v258_v25, 0.0 }
 0x127   :  { %v390_v26 = vpop.eup %389 }
 0x128   :  { %v260_v27 = vmul.f32 %v390_v26, %v258_v25 }
 0x12a   :  { %v262_v29 = vsel %vm261_vm3, %v258_v25, %v260_v27 }
 0x12b   :  { %v265_v30 = vsel %vm263_vm4, %v264_v28, %v262_v29 }
 0x12c   :  { %v266_v31 = vadd.f32 1.0, %v265_v30 }
 0x12e   :  { %391 = vrcp.f32 %v266_v31 }
 0x138   :  { %v392_v32 = vpop.eup %391 }
 0x139   :  { %269 = vst [vmem:[#allocation2] sm:$0xff] %v392_v32 }
 0x13a   :  { %404 = shalt.err (!%p401_p4)
}
 0x13b   :  { %s405_s18 = scalar_lea.hbm %s549_s2, 128 }
 0x13c   :  { %p406_p5 = scmp.ne.s32.totalorder %s549_s2, %s405_s18  ;;  %p409_p6 = scmp.lt.u32.totalorder %s405_s18, %s549_s2 }
 0x13e   :  { %p411_p7 = pnand %p409_p6, %p406_p5 }
 0x140   :  { %414 = shalt.err (!%p411_p7)
}
 0x141   :  { %279 = dma.vmem_to_hbm [thread:$0]  %s277_s1, 128, %s549_s2, [#allocation3]  }
 0x142   :  { %415 = dma.done.wait [#allocation3], 128  }
 0x143   :  { %416 = vsyncadd [#allocation3], 4294967168 }
 0x144   :  { %283 = vsyncpa [#allocation3], 1 }

</bundles_post_ra>
